<compile_context>
chip_gen: v6e
topology: v6e:2x2x1
jax: 0.10.0
libtpu: 0.0.40
codegen_flags: <defaults>
</compile_context>

<pallas_src>
import functools

import jax
import jax.numpy as jnp
import numpy as np
from jax import lax
from jax.experimental import pallas as pl
from jax.experimental.pallas import tpu as pltpu


# ----------------------------------------------------------------------------
# In-kernel compute helpers
# ----------------------------------------------------------------------------
def _silu(x):
    return x * jax.nn.sigmoid(x)


def _group_norm(x, M, MT, gamma, beta, *, n, eps=1e-5):
    """GroupNorm over (C, L) for one batch element.

    M: (G, C) 0/1 group-selection mask, MT: (C, G) its transpose (both precomputed).
    Two-pass (mean, then E[(x-mean)^2]) for robustness; affine folded into inv-std column.
    """
    s_c = jnp.sum(x, axis=-1, keepdims=True)                                   # (C, 1)
    mean_g = jnp.dot(M, s_c, preferred_element_type=jnp.float32) / n           # (G, 1)
    mean_c = jnp.dot(MT, mean_g, preferred_element_type=jnp.float32)           # (C, 1)
    d = x - mean_c
    ss_c = jnp.sum(d * d, axis=-1, keepdims=True)                              # (C, 1)
    var_g = jnp.dot(M, ss_c, preferred_element_type=jnp.float32) / n           # (G, 1)
    inv_g = lax.rsqrt(var_g + eps)
    inv_c = jnp.dot(MT, inv_g, preferred_element_type=jnp.float32)             # (C, 1)
    scale_c = inv_c * gamma                                                    # folded affine
    return d * scale_c + beta


def _conv3_same(h, w3, bias, *, matmul_dtype):
    """k=3, stride=1, pad=1 conv as 3 tap matmuls accumulated in f32 (no im2col).

    h: (C, L) f32;  w3: (3, C_out, C) in matmul_dtype;  bias: (C_out, 1) f32.
    out[:, l] = w3[0] @ h[:, l-1] + w3[1] @ h[:, l] + w3[2] @ h[:, l+1]  (zero padded).
    """
    C, L = h.shape
    hm = h.astype(matmul_dtype)
    z = jnp.zeros((C, 1), matmul_dtype)
    h_m1 = jnp.concatenate([z, hm[:, :L - 1]], axis=1)        # col l holds h[:, l-1]
    h_p1 = jnp.concatenate([hm[:, 1:], z], axis=1)            # col l holds h[:, l+1]
    acc = jnp.dot(w3[0], h_m1, preferred_element_type=jnp.float32)
    acc = acc + jnp.dot(w3[1], hm, preferred_element_type=jnp.float32)
    acc = acc + jnp.dot(w3[2], h_p1, preferred_element_type=jnp.float32)
    return acc + bias


def _pick_vmem_limit():
    """~3/4 of physical VMEM: ~96 MiB on v5e/v6e (128 MiB), ~48 MiB on v7x (64 MiB)."""
    try:
        cap = int(pltpu.get_tpu_info().vmem_capacity_bytes)
        return int(min(100 * 2**20, (cap * 3) // 4))
    except Exception:
        return 48 * 2**20          # safe on every generation


# ----------------------------------------------------------------------------
# Fused DownsampleBlock1d forward (one pallas_call, grid = (batch, layer))
# ----------------------------------------------------------------------------
def downsample_block1d_pallas(x, params, *, factor, num_groups,
                              kernel_multiplier=2, matmul_dtype=jnp.float32,
                              eps=1e-5):
    """x: (B, C_in, L_in).  Returns (B, C_out, L_out)."""
    B, C_in, L_in = x.shape
    down_w = params["down_w"]                       # (C_out, C_in, K)
    C_out, _, K = down_w.shape
    assert K == factor * kernel_multiplier + 1
    pad = factor * (kernel_multiplier // 2)
    L_out = (L_in + 2 * pad - K) // factor + 1
    q_off_max = (K - 1) // factor
    Lp = L_out + q_off_max
    total = factor * Lp
    right_pad = total - L_in - pad
    assert right_pad >= 0, (factor, kernel_multiplier, L_in, right_pad)

    blocks = params["blocks"]
    nl = len(blocks)
    assert nl >= 1, "fused kernel expects at least one ResnetBlock1d"
    G = num_groups
    assert C_out % G == 0
    Cg = C_out // G
    n_elems = float(Cg * L_out)

    # ---- one-time wrapper-side prep (hoisted out of the kernel / hot loop) ----
    # Polyphase, zero-padded view of x, already in matmul_dtype (halves DMA + VMEM):
    #   xp[b, r, c, q] = x_padded[b, c, q*factor + r]
    # Downsample tap k then reads phase (k % factor) at the static contiguous lane slice
    # [k//factor : k//factor + L_out] -- no strided / gather access inside the kernel.
    xpad = jnp.pad(x.astype(matmul_dtype), ((0, 0), (0, 0), (pad, right_pad)))
    xp = xpad.reshape(B, C_in, Lp, factor).transpose(0, 3, 1, 2)   # (B, factor, C_in, Lp)

    # Per-tap conv weights: wd[k] = down_w[:, :, k]  (K, C_out, C_in).
    wd = jnp.transpose(down_w, (2, 0, 1)).astype(matmul_dtype)
    bd = params["down_b"].reshape(C_out, 1).astype(jnp.float32)

    # GroupNorm 0/1 group-selection masks (built once, passed as constants).
    cid = np.arange(C_out)
    M_np = (cid[None, :] // Cg == np.arange(G)[:, None]).astype(np.float32)    # (G, C)
    M = jnp.asarray(M_np)
    MT = jnp.asarray(M_np.T)                                                    # (C, G)

    def stack(key, fn):
        return jnp.stack([fn(b[key]) for b in blocks], axis=0)

    as_col = lambda a: a.reshape(C_out, 1).astype(jnp.float32)
    as_w3 = lambda a: jnp.transpose(a, (2, 0, 1)).astype(matmul_dtype)   # (3, C_out, C_out)

    g1 = stack("gn1_w", as_col); b1 = stack("gn1_b", as_col)
    w1 = stack("conv1_w", as_w3); c1 = stack("conv1_b", as_col)
    g2 = stack("gn2_w", as_col); b2 = stack("gn2_b", as_col)
    w2 = stack("conv2_w", as_w3); c2 = stack("conv2_b", as_col)

    # ---- kernel body: grid step = (batch element, resnet layer) ----
    def kernel(xp_ref, wd_ref, bd_ref, M_ref, MT_ref,
               g1_ref, b1_ref, w1_ref, c1_ref,
               g2_ref, b2_ref, w2_ref, c2_ref,
               o_ref, xcur_ref):
        layer = pl.program_id(1)

        # Downsample1d (strided conv) once per batch element: per-tap polyphase matmuls.
        @pl.when(layer == 0)
        def _():
            acc = jnp.zeros((C_out, L_out), jnp.float32)
            for k in range(K):                                   # static unroll, K taps
                r = k % factor
                q0 = k // factor
                rhs = xp_ref[0, r][:, q0:q0 + L_out]             # (C_in, L_out)
                acc = acc + jnp.dot(wd_ref[k], rhs,
                                    preferred_element_type=jnp.float32)
            xcur_ref[...] = acc + bd_ref[...]

        # One ResnetBlock1d per grid step along the (innermost) layer axis.
        xb = xcur_ref[...]
        Mm = M_ref[...]
        MTm = MT_ref[...]
        h = _group_norm(xb, Mm, MTm, g1_ref[0], b1_ref[0], n=n_elems, eps=eps)
        h = _silu(h)
        h = _conv3_same(h, w1_ref[0], c1_ref[0], matmul_dtype=matmul_dtype)
        h = _group_norm(h, Mm, MTm, g2_ref[0], b2_ref[0], n=n_elems, eps=eps)
        h = _silu(h)
        h = _conv3_same(h, w2_ref[0], c2_ref[0], matmul_dtype=matmul_dtype)
        xcur_ref[...] = h + xb                                   # to_out == Identity

        @pl.when(layer == nl - 1)
        def _():
            o_ref[0] = xcur_ref[...].astype(o_ref.dtype)

    # Batch-invariant / layer-invariant constants.
    def const_spec(shape):
        return pl.BlockSpec(shape, lambda b, l, _s=shape: (0,) * len(_s))

    per_layer_col = pl.BlockSpec((1, C_out, 1), lambda b, l: (l, 0, 0))
    per_layer_w3 = pl.BlockSpec((1, 3, C_out, C_out), lambda b, l: (l, 0, 0, 0))

    operands = (xp, wd, bd, M, MT, g1, b1, w1, c1, g2, b2, w2, c2)
    nbytes = lambda a: int(np.prod(a.shape)) * a.dtype.itemsize
    flops = 2 * B * L_out * C_out * (C_in * K + nl * 2 * 3 * C_out)
    cost = pl.CostEstimate(
        flops=int(flops),
        transcendentals=int(B * nl * 2 * C_out * L_out),
        bytes_accessed=int(sum(nbytes(a) for a in operands)
                           + B * C_out * L_out * x.dtype.itemsize),
    )

    return pl.pallas_call(
        kernel,
        out_shape=jax.ShapeDtypeStruct((B, C_out, L_out), x.dtype),
        grid=(B, nl),
        in_specs=[
            pl.BlockSpec((1, factor, C_in, Lp), lambda b, l: (b, 0, 0, 0)),
            const_spec((K, C_out, C_in)),
            const_spec((C_out, 1)),
            const_spec((G, C_out)),
            const_spec((C_out, G)),
            per_layer_col, per_layer_col, per_layer_w3, per_layer_col,
            per_layer_col, per_layer_col, per_layer_w3, per_layer_col,
        ],
        out_specs=pl.BlockSpec((1, C_out, L_out), lambda b, l: (b, 0, 0)),
        scratch_shapes=[pltpu.VMEM((C_out, L_out), jnp.float32)],
        compiler_params=pltpu.CompilerParams(
            dimension_semantics=("parallel", "arbitrary"),
            vmem_limit_bytes=_pick_vmem_limit(),
        ),
        cost_estimate=cost,
    )(xp, wd, bd, M, MT, g1, b1, w1, c1, g2, b2, w2, c2)


# ----------------------------------------------------------------------------
# Plain-JAX reference (for validation only)
# ----------------------------------------------------------------------------
def _ref_conv1d(x, w, b, stride, pad):
    out = lax.conv_general_dilated(
        x, w, window_strides=(stride,), padding=[(pad, pad)],
        dimension_numbers=("NCH", "OIH", "NCH"),
        precision=lax.Precision.HIGHEST)
    return out + b[None, :, None]


def _ref_groupnorm(x, gamma, beta, G, eps=1e-5):
    B, C, L = x.shape
    xr = x.reshape(B, G, -1)
    mean = xr.mean(-1, keepdims=True)
    var = ((xr - mean) ** 2).mean(-1, keepdims=True)
    xn = ((xr - mean) * lax.rsqrt(var + eps)).reshape(B, C, L)
    return xn * gamma[None, :, None] + beta[None, :, None]


def _ref_forward(x, params, *, factor, num_groups, kernel_multiplier=2):
    dw = params["down_w"]
    pad = factor * (kernel_multiplier // 2)
    x = _ref_conv1d(x, dw, params["down_b"], factor, pad)
    for p in params["blocks"]:
        h = _ref_conv1d(_silu(_ref_groupnorm(x, p["gn1_w"], p["gn1_b"], num_groups)),
                        p["conv1_w"], p["conv1_b"], 1, 1)
        h = _ref_conv1d(_silu(_ref_groupnorm(h, p["gn2_w"], p["gn2_b"], num_groups)),
                        p["conv2_w"], p["conv2_b"], 1, 1)
        x = h + x
    return x


# ----------------------------------------------------------------------------
# Main
# ----------------------------------------------------------------------------
if __name__ == "__main__":
    B = 2
    in_channels = 4
    out_channels = 8
    L = 16
    factor = 2
    kernel_multiplier = 2
    num_groups = 4           # must divide out_channels
    num_layers = 2
    K_down = factor * kernel_multiplier + 1   # 5

    key = jax.random.PRNGKey(0)
    keys = iter(jax.random.split(key, 64))

    def nrm(shape, scale=0.1):
        return scale * jax.random.normal(next(keys), shape, dtype=jnp.float32)

    params = {
        "down_w": nrm((out_channels, in_channels, K_down)),
        "down_b": nrm((out_channels,)),
        "blocks": [],
    }
    for _ in range(num_layers):
        params["blocks"].append({
            "gn1_w": 1.0 + nrm((out_channels,)),
            "gn1_b": nrm((out_channels,)),
            "conv1_w": nrm((out_channels, out_channels, 3)),
            "conv1_b": nrm((out_channels,)),
            "gn2_w": 1.0 + nrm((out_channels,)),
            "gn2_b": nrm((out_channels,)),
            "conv2_w": nrm((out_channels, out_channels, 3)),
            "conv2_b": nrm((out_channels,)),
        })

    x = jax.random.normal(next(keys), (B, in_channels, L), dtype=jnp.float32)

    # f32 matmul operands at these toy shapes for exact validation against the f32
    # reference; in production set matmul_dtype=jnp.bfloat16 (halves input DMA / weight
    # VMEM, full-rate MXU on v5e/v6e/v7x) -- accumulation is f32 either way.
    fwd = functools.partial(downsample_block1d_pallas, factor=factor,
                            num_groups=num_groups,
                            kernel_multiplier=kernel_multiplier,
                            matmul_dtype=jnp.float32)
    out = jax.block_until_ready(fwd(x, params))

    ref = jax.block_until_ready(
        _ref_forward(x, params, factor=factor, num_groups=num_groups,
                     kernel_multiplier=kernel_multiplier))

    assert out.shape == (B, out_channels, L // factor), out.shape
    np.testing.assert_allclose(np.asarray(out), np.asarray(ref), rtol=2e-2, atol=2e-2)

    print("KERNEL_OK")
</pallas_src>

<mosaic_0001>
module attributes {stable_mosaic.version = 11 : i64} {
  func.func @kernel(%arg0: i32, %arg1: i32, %arg2: memref<1x2x4x10xf32, #tpu.memory_space<vmem>>, %arg3: memref<5x8x4xf32, #tpu.memory_space<vmem>>, %arg4: memref<8x1xf32, #tpu.memory_space<vmem>>, %arg5: memref<4x8xf32, #tpu.memory_space<vmem>>, %arg6: memref<8x4xf32, #tpu.memory_space<vmem>>, %arg7: memref<1x8x1xf32, #tpu.memory_space<vmem>>, %arg8: memref<1x8x1xf32, #tpu.memory_space<vmem>>, %arg9: memref<1x3x8x8xf32, #tpu.memory_space<vmem>>, %arg10: memref<1x8x1xf32, #tpu.memory_space<vmem>>, %arg11: memref<1x8x1xf32, #tpu.memory_space<vmem>>, %arg12: memref<1x8x1xf32, #tpu.memory_space<vmem>>, %arg13: memref<1x3x8x8xf32, #tpu.memory_space<vmem>>, %arg14: memref<1x8x1xf32, #tpu.memory_space<vmem>>, %arg15: memref<1x8x8xf32, #tpu.memory_space<vmem>>, %arg16: memref<8x8xf32, #tpu.memory_space<vmem>>) attributes {dimension_semantics = [#tpu.dimension_semantics<parallel>, #tpu.dimension_semantics<arbitrary>], iteration_bounds = array<i64: 2, 2>, scalar_prefetch = 0 : i64, scratch_operands = 1 : i64, tpu.core_type = #tpu.core_type<tc>, window_params = [{transform_indices = @transform_0, window_bounds = array<i64: 1, 2, 4, 10>}, {pipeline_mode = #tpu.pipeline_mode<synchronous>, transform_indices = @transform_1, window_bounds = array<i64: 5, 8, 4>}, {pipeline_mode = #tpu.pipeline_mode<synchronous>, transform_indices = @transform_2, window_bounds = array<i64: 8, 1>}, {pipeline_mode = #tpu.pipeline_mode<synchronous>, transform_indices = @transform_3, window_bounds = array<i64: 4, 8>}, {pipeline_mode = #tpu.pipeline_mode<synchronous>, transform_indices = @transform_4, window_bounds = array<i64: 8, 4>}, {transform_indices = @transform_5, window_bounds = array<i64: 1, 8, 1>}, {transform_indices = @transform_6, window_bounds = array<i64: 1, 8, 1>}, {transform_indices = @transform_7, window_bounds = array<i64: 1, 3, 8, 8>}, {transform_indices = @transform_8, window_bounds = array<i64: 1, 8, 1>}, {transform_indices = @transform_9, window_bounds = array<i64: 1, 8, 1>}, {transform_indices = @transform_10, window_bounds = array<i64: 1, 8, 1>}, {transform_indices = @transform_11, window_bounds = array<i64: 1, 3, 8, 8>}, {transform_indices = @transform_12, window_bounds = array<i64: 1, 8, 1>}, {transform_indices = @transform_13, window_bounds = array<i64: 1, 8, 8>}]} {
    %c0_i32 = arith.constant 0 : i32
    %0 = arith.cmpi eq, %arg1, %c0_i32 : i32
    %1 = arith.extui %0 : i1 to i32
    %c0_i32_0 = arith.constant 0 : i32
    %2 = arith.cmpi ne, %1, %c0_i32_0 : i32
    scf.if %2 {
      %cst_62 = arith.constant 0.000000e+00 : f32
      %121 = vector.broadcast %cst_62 : f32 to vector<8x8xf32>
      %c0_63 = arith.constant 0 : index
      %c0_64 = arith.constant 0 : index
      %c0_65 = arith.constant 0 : index
      %c0_66 = arith.constant 0 : index
      %122 = vector.load %arg2[%c0_63, %c0_64, %c0_65, %c0_66] : memref<1x2x4x10xf32, #tpu.memory_space<vmem>>, vector<1x1x4x10xf32>
      %123 = vector.shape_cast %122 : vector<1x1x4x10xf32> to vector<4x10xf32>
      %124 = vector.extract_strided_slice %123 {offsets = [0, 0], sizes = [4, 8], strides = [1, 1]} : vector<4x10xf32> to vector<4x8xf32>
      %c0_67 = arith.constant 0 : index
      %c0_68 = arith.constant 0 : index
      %c0_69 = arith.constant 0 : index
      %125 = vector.load %arg3[%c0_67, %c0_68, %c0_69] : memref<5x8x4xf32, #tpu.memory_space<vmem>>, vector<1x8x4xf32>
      %126 = vector.shape_cast %125 : vector<1x8x4xf32> to vector<8x4xf32>
      %cst_70 = arith.constant dense<0.000000e+00> : vector<8x8xf32>
      %127 = tpu.matmul %126, %124, %cst_70 {dimension_numbers = #tpu.dot_dimension_numbers<[1], [0], [0], [1], [0, 0, 1, 1], [], []>} : vector<8x4xf32>, vector<4x8xf32>, vector<8x8xf32> -> vector<8x8xf32>
      %128 = arith.addf %121, %127 : vector<8x8xf32>
      %c0_71 = arith.constant 0 : index
      %c1 = arith.constant 1 : index
      %c0_72 = arith.constant 0 : index
      %c0_73 = arith.constant 0 : index
      %129 = vector.load %arg2[%c0_71, %c1, %c0_72, %c0_73] : memref<1x2x4x10xf32, #tpu.memory_space<vmem>>, vector<1x1x4x10xf32>
      %130 = vector.shape_cast %129 : vector<1x1x4x10xf32> to vector<4x10xf32>
      %131 = vector.extract_strided_slice %130 {offsets = [0, 0], sizes = [4, 8], strides = [1, 1]} : vector<4x10xf32> to vector<4x8xf32>
      %c1_74 = arith.constant 1 : index
      %c0_75 = arith.constant 0 : index
      %c0_76 = arith.constant 0 : index
      %132 = vector.load %arg3[%c1_74, %c0_75, %c0_76] : memref<5x8x4xf32, #tpu.memory_space<vmem>>, vector<1x8x4xf32>
      %133 = vector.shape_cast %132 : vector<1x8x4xf32> to vector<8x4xf32>
      %cst_77 = arith.constant dense<0.000000e+00> : vector<8x8xf32>
      %134 = tpu.matmul %133, %131, %cst_77 {dimension_numbers = #tpu.dot_dimension_numbers<[1], [0], [0], [1], [0, 0, 1, 1], [], []>} : vector<8x4xf32>, vector<4x8xf32>, vector<8x8xf32> -> vector<8x8xf32>
      %135 = arith.addf %128, %134 : vector<8x8xf32>
      %c0_78 = arith.constant 0 : index
      %c0_79 = arith.constant 0 : index
      %c0_80 = arith.constant 0 : index
      %c0_81 = arith.constant 0 : index
      %136 = vector.load %arg2[%c0_78, %c0_79, %c0_80, %c0_81] : memref<1x2x4x10xf32, #tpu.memory_space<vmem>>, vector<1x1x4x10xf32>
      %137 = vector.shape_cast %136 : vector<1x1x4x10xf32> to vector<4x10xf32>
      %138 = vector.extract_strided_slice %137 {offsets = [0, 1], sizes = [4, 8], strides = [1, 1]} : vector<4x10xf32> to vector<4x8xf32>
      %c2 = arith.constant 2 : index
      %c0_82 = arith.constant 0 : index
      %c0_83 = arith.constant 0 : index
      %139 = vector.load %arg3[%c2, %c0_82, %c0_83] : memref<5x8x4xf32, #tpu.memory_space<vmem>>, vector<1x8x4xf32>
      %140 = vector.shape_cast %139 : vector<1x8x4xf32> to vector<8x4xf32>
      %cst_84 = arith.constant dense<0.000000e+00> : vector<8x8xf32>
      %141 = tpu.matmul %140, %138, %cst_84 {dimension_numbers = #tpu.dot_dimension_numbers<[1], [0], [0], [1], [0, 0, 1, 1], [], []>} : vector<8x4xf32>, vector<4x8xf32>, vector<8x8xf32> -> vector<8x8xf32>
      %142 = arith.addf %135, %141 : vector<8x8xf32>
      %c0_85 = arith.constant 0 : index
      %c1_86 = arith.constant 1 : index
      %c0_87 = arith.constant 0 : index
      %c0_88 = arith.constant 0 : index
      %143 = vector.load %arg2[%c0_85, %c1_86, %c0_87, %c0_88] : memref<1x2x4x10xf32, #tpu.memory_space<vmem>>, vector<1x1x4x10xf32>
      %144 = vector.shape_cast %143 : vector<1x1x4x10xf32> to vector<4x10xf32>
      %145 = vector.extract_strided_slice %144 {offsets = [0, 1], sizes = [4, 8], strides = [1, 1]} : vector<4x10xf32> to vector<4x8xf32>
      %c3 = arith.constant 3 : index
      %c0_89 = arith.constant 0 : index
      %c0_90 = arith.constant 0 : index
      %146 = vector.load %arg3[%c3, %c0_89, %c0_90] : memref<5x8x4xf32, #tpu.memory_space<vmem>>, vector<1x8x4xf32>
      %147 = vector.shape_cast %146 : vector<1x8x4xf32> to vector<8x4xf32>
      %cst_91 = arith.constant dense<0.000000e+00> : vector<8x8xf32>
      %148 = tpu.matmul %147, %145, %cst_91 {dimension_numbers = #tpu.dot_dimension_numbers<[1], [0], [0], [1], [0, 0, 1, 1], [], []>} : vector<8x4xf32>, vector<4x8xf32>, vector<8x8xf32> -> vector<8x8xf32>
      %149 = arith.addf %142, %148 : vector<8x8xf32>
      %c0_92 = arith.constant 0 : index
      %c0_93 = arith.constant 0 : index
      %c0_94 = arith.constant 0 : index
      %c0_95 = arith.constant 0 : index
      %150 = vector.load %arg2[%c0_92, %c0_93, %c0_94, %c0_95] : memref<1x2x4x10xf32, #tpu.memory_space<vmem>>, vector<1x1x4x10xf32>
      %151 = vector.shape_cast %150 : vector<1x1x4x10xf32> to vector<4x10xf32>
      %152 = vector.extract_strided_slice %151 {offsets = [0, 2], sizes = [4, 8], strides = [1, 1]} : vector<4x10xf32> to vector<4x8xf32>
      %c4 = arith.constant 4 : index
      %c0_96 = arith.constant 0 : index
      %c0_97 = arith.constant 0 : index
      %153 = vector.load %arg3[%c4, %c0_96, %c0_97] : memref<5x8x4xf32, #tpu.memory_space<vmem>>, vector<1x8x4xf32>
      %154 = vector.shape_cast %153 : vector<1x8x4xf32> to vector<8x4xf32>
      %cst_98 = arith.constant dense<0.000000e+00> : vector<8x8xf32>
      %155 = tpu.matmul %154, %152, %cst_98 {dimension_numbers = #tpu.dot_dimension_numbers<[1], [0], [0], [1], [0, 0, 1, 1], [], []>} : vector<8x4xf32>, vector<4x8xf32>, vector<8x8xf32> -> vector<8x8xf32>
      %156 = arith.addf %149, %155 : vector<8x8xf32>
      %c0_99 = arith.constant 0 : index
      %c0_100 = arith.constant 0 : index
      %157 = vector.load %arg4[%c0_99, %c0_100] : memref<8x1xf32, #tpu.memory_space<vmem>>, vector<8x1xf32>
      %158 = vector.broadcast %157 : vector<8x1xf32> to vector<8x8xf32>
      %159 = arith.addf %156, %158 : vector<8x8xf32>
      %c0_101 = arith.constant 0 : index
      %c0_102 = arith.constant 0 : index
      %160 = vector.load %arg16[%c0_101, %c0_102] : memref<8x8xf32, #tpu.memory_space<vmem>>, vector<8x8xf32>
      tpu.vector_store %arg16[%c0_101, %c0_102], %159 {strides = array<i32>} : memref<8x8xf32, #tpu.memory_space<vmem>>, vector<8x8xf32>,
    } else {
    }
    %c0 = arith.constant 0 : index
    %c0_1 = arith.constant 0 : index
    %3 = vector.load %arg16[%c0, %c0_1] : memref<8x8xf32, #tpu.memory_space<vmem>>, vector<8x8xf32>
    %c0_2 = arith.constant 0 : index
    %c0_3 = arith.constant 0 : index
    %4 = vector.load %arg5[%c0_2, %c0_3] : memref<4x8xf32, #tpu.memory_space<vmem>>, vector<4x8xf32>
    %c0_4 = arith.constant 0 : index
    %c0_5 = arith.constant 0 : index
    %5 = vector.load %arg6[%c0_4, %c0_5] : memref<8x4xf32, #tpu.memory_space<vmem>>, vector<8x4xf32>
    %c0_6 = arith.constant 0 : index
    %c0_7 = arith.constant 0 : index
    %c0_8 = arith.constant 0 : index
    %6 = vector.load %arg7[%c0_6, %c0_7, %c0_8] : memref<1x8x1xf32, #tpu.memory_space<vmem>>, vector<1x8x1xf32>
    %7 = vector.shape_cast %6 : vector<1x8x1xf32> to vector<8x1xf32>
    %c0_9 = arith.constant 0 : index
    %c0_10 = arith.constant 0 : index
    %c0_11 = arith.constant 0 : index
    %8 = vector.load %arg8[%c0_9, %c0_10, %c0_11] : memref<1x8x1xf32, #tpu.memory_space<vmem>>, vector<1x8x1xf32>
    %9 = vector.shape_cast %8 : vector<1x8x1xf32> to vector<8x1xf32>
    %cst = arith.constant dense<0.000000e+00> : vector<8xf32>
    %10 = vector.multi_reduction <add>, %3, %cst [1] : vector<8x8xf32> to vector<8xf32>
    %11 = vector.shape_cast %10 : vector<8xf32> to vector<8x1xf32>
    %cst_12 = arith.constant dense<0.000000e+00> : vector<4x1xf32>
    %12 = tpu.matmul %4, %11, %cst_12 {dimension_numbers = #tpu.dot_dimension_numbers<[1], [0], [0], [1], [0, 0, 1, 1], [], []>} : vector<4x8xf32>, vector<8x1xf32>, vector<4x1xf32> -> vector<4x1xf32>
    %cst_13 = arith.constant 1.600000e+01 : f32
    %13 = vector.broadcast %cst_13 : f32 to vector<4x1xf32>
    %14 = arith.divf %12, %13 : vector<4x1xf32>
    %cst_14 = arith.constant dense<0.000000e+00> : vector<8x1xf32>
    %15 = tpu.matmul %5, %14, %cst_14 {dimension_numbers = #tpu.dot_dimension_numbers<[1], [0], [0], [1], [0, 0, 1, 1], [], []>} : vector<8x4xf32>, vector<4x1xf32>, vector<8x1xf32> -> vector<8x1xf32>
    %16 = vector.broadcast %15 : vector<8x1xf32> to vector<8x8xf32>
    %17 = arith.subf %3, %16 : vector<8x8xf32>
    %18 = arith.mulf %17, %17 : vector<8x8xf32>
    %cst_15 = arith.constant dense<0.000000e+00> : vector<8xf32>
    %19 = vector.multi_reduction <add>, %18, %cst_15 [1] : vector<8x8xf32> to vector<8xf32>
    %20 = vector.shape_cast %19 : vector<8xf32> to vector<8x1xf32>
    %cst_16 = arith.constant dense<0.000000e+00> : vector<4x1xf32>
    %21 = tpu.matmul %4, %20, %cst_16 {dimension_numbers = #tpu.dot_dimension_numbers<[1], [0], [0], [1], [0, 0, 1, 1], [], []>} : vector<4x8xf32>, vector<8x1xf32>, vector<4x1xf32> -> vector<4x1xf32>
    %cst_17 = arith.constant 1.600000e+01 : f32
    %22 = vector.broadcast %cst_17 : f32 to vector<4x1xf32>
    %23 = arith.divf %21, %22 : vector<4x1xf32>
    %cst_18 = arith.constant 9.99999974E-6 : f32
    %24 = vector.broadcast %cst_18 : f32 to vector<4x1xf32>
    %25 = arith.addf %23, %24 : vector<4x1xf32>
    %26 = math.rsqrt %25 : vector<4x1xf32>
    %cst_19 = arith.constant dense<0.000000e+00> : vector<8x1xf32>
    %27 = tpu.matmul %5, %26, %cst_19 {dimension_numbers = #tpu.dot_dimension_numbers<[1], [0], [0], [1], [0, 0, 1, 1], [], []>} : vector<8x4xf32>, vector<4x1xf32>, vector<8x1xf32> -> vector<8x1xf32>
    %28 = arith.mulf %27, %7 : vector<8x1xf32>
    %29 = vector.broadcast %28 : vector<8x1xf32> to vector<8x8xf32>
    %30 = arith.mulf %17, %29 : vector<8x8xf32>
    %31 = vector.broadcast %9 : vector<8x1xf32> to vector<8x8xf32>
    %32 = arith.addf %30, %31 : vector<8x8xf32>
    %33 = arith.negf %32 : vector<8x8xf32>
    %34 = math.exp %33 : vector<8x8xf32>
    %cst_20 = arith.constant 1.000000e+00 : f32
    %35 = vector.broadcast %cst_20 : f32 to vector<8x8xf32>
    %36 = arith.addf %35, %34 : vector<8x8xf32>
    %37 = arith.divf %35, %36 : vector<8x8xf32>
    %38 = arith.mulf %32, %37 : vector<8x8xf32>
    %c0_21 = arith.constant 0 : index
    %c0_22 = arith.constant 0 : index
    %c0_23 = arith.constant 0 : index
    %c0_24 = arith.constant 0 : index
    %39 = vector.load %arg9[%c0_21, %c0_22, %c0_23, %c0_24] : memref<1x3x8x8xf32, #tpu.memory_space<vmem>>, vector<1x3x8x8xf32>
    %40 = vector.shape_cast %39 : vector<1x3x8x8xf32> to vector<3x8x8xf32>
    %c0_25 = arith.constant 0 : index
    %c0_26 = arith.constant 0 : index
    %c0_27 = arith.constant 0 : index
    %41 = vector.load %arg10[%c0_25, %c0_26, %c0_27] : memref<1x8x1xf32, #tpu.memory_space<vmem>>, vector<1x8x1xf32>
    %42 = vector.shape_cast %41 : vector<1x8x1xf32> to vector<8x1xf32>
    %cst_28 = arith.constant 0.000000e+00 : f32
    %43 = vector.broadcast %cst_28 : f32 to vector<8x1xf32>
    %44 = vector.extract_strided_slice %38 {offsets = [0, 0], sizes = [8, 7], strides = [1, 1]} : vector<8x8xf32> to vector<8x7xf32>
    %45 = tpu.concatenate %43, %44 in 1 : vector<8x1xf32>, vector<8x7xf32> -> vector<8x8xf32>
    %46 = vector.extract_strided_slice %38 {offsets = [0, 1], sizes = [8, 7], strides = [1, 1]} : vector<8x8xf32> to vector<8x7xf32>
    %47 = tpu.concatenate %46, %43 in 1 : vector<8x7xf32>, vector<8x1xf32> -> vector<8x8xf32>
    %48 = vector.extract_strided_slice %40 {offsets = [0, 0, 0], sizes = [1, 8, 8], strides = [1, 1, 1]} : vector<3x8x8xf32> to vector<1x8x8xf32>
    %49 = vector.shape_cast %48 : vector<1x8x8xf32> to vector<8x8xf32>
    %cst_29 = arith.constant dense<0.000000e+00> : vector<8x8xf32>
    %50 = tpu.matmul %49, %45, %cst_29 {dimension_numbers = #tpu.dot_dimension_numbers<[1], [0], [0], [1], [0, 0, 1, 1], [], []>} : vector<8x8xf32>, vector<8x8xf32>, vector<8x8xf32> -> vector<8x8xf32>
    %51 = vector.extract_strided_slice %40 {offsets = [1, 0, 0], sizes = [1, 8, 8], strides = [1, 1, 1]} : vector<3x8x8xf32> to vector<1x8x8xf32>
    %52 = vector.shape_cast %51 : vector<1x8x8xf32> to vector<8x8xf32>
    %cst_30 = arith.constant dense<0.000000e+00> : vector<8x8xf32>
    %53 = tpu.matmul %52, %38, %cst_30 {dimension_numbers = #tpu.dot_dimension_numbers<[1], [0], [0], [1], [0, 0, 1, 1], [], []>} : vector<8x8xf32>, vector<8x8xf32>, vector<8x8xf32> -> vector<8x8xf32>
    %54 = arith.addf %50, %53 : vector<8x8xf32>
    %55 = vector.extract_strided_slice %40 {offsets = [2, 0, 0], sizes = [1, 8, 8], strides = [1, 1, 1]} : vector<3x8x8xf32> to vector<1x8x8xf32>
    %56 = vector.shape_cast %55 : vector<1x8x8xf32> to vector<8x8xf32>
    %cst_31 = arith.constant dense<0.000000e+00> : vector<8x8xf32>
    %57 = tpu.matmul %56, %47, %cst_31 {dimension_numbers = #tpu.dot_dimension_numbers<[1], [0], [0], [1], [0, 0, 1, 1], [], []>} : vector<8x8xf32>, vector<8x8xf32>, vector<8x8xf32> -> vector<8x8xf32>
    %58 = arith.addf %54, %57 : vector<8x8xf32>
    %59 = vector.broadcast %42 : vector<8x1xf32> to vector<8x8xf32>
    %60 = arith.addf %58, %59 : vector<8x8xf32>
    %c0_32 = arith.constant 0 : index
    %c0_33 = arith.constant 0 : index
    %c0_34 = arith.constant 0 : index
    %61 = vector.load %arg11[%c0_32, %c0_33, %c0_34] : memref<1x8x1xf32, #tpu.memory_space<vmem>>, vector<1x8x1xf32>
    %62 = vector.shape_cast %61 : vector<1x8x1xf32> to vector<8x1xf32>
    %c0_35 = arith.constant 0 : index
    %c0_36 = arith.constant 0 : index
    %c0_37 = arith.constant 0 : index
    %63 = vector.load %arg12[%c0_35, %c0_36, %c0_37] : memref<1x8x1xf32, #tpu.memory_space<vmem>>, vector<1x8x1xf32>
    %64 = vector.shape_cast %63 : vector<1x8x1xf32> to vector<8x1xf32>
    %cst_38 = arith.constant dense<0.000000e+00> : vector<8xf32>
    %65 = vector.multi_reduction <add>, %60, %cst_38 [1] : vector<8x8xf32> to vector<8xf32>
    %66 = vector.shape_cast %65 : vector<8xf32> to vector<8x1xf32>
    %cst_39 = arith.constant dense<0.000000e+00> : vector<4x1xf32>
    %67 = tpu.matmul %4, %66, %cst_39 {dimension_numbers = #tpu.dot_dimension_numbers<[1], [0], [0], [1], [0, 0, 1, 1], [], []>} : vector<4x8xf32>, vector<8x1xf32>, vector<4x1xf32> -> vector<4x1xf32>
    %cst_40 = arith.constant 1.600000e+01 : f32
    %68 = vector.broadcast %cst_40 : f32 to vector<4x1xf32>
    %69 = arith.divf %67, %68 : vector<4x1xf32>
    %cst_41 = arith.constant dense<0.000000e+00> : vector<8x1xf32>
    %70 = tpu.matmul %5, %69, %cst_41 {dimension_numbers = #tpu.dot_dimension_numbers<[1], [0], [0], [1], [0, 0, 1, 1], [], []>} : vector<8x4xf32>, vector<4x1xf32>, vector<8x1xf32> -> vector<8x1xf32>
    %71 = vector.broadcast %70 : vector<8x1xf32> to vector<8x8xf32>
    %72 = arith.subf %60, %71 : vector<8x8xf32>
    %73 = arith.mulf %72, %72 : vector<8x8xf32>
    %cst_42 = arith.constant dense<0.000000e+00> : vector<8xf32>
    %74 = vector.multi_reduction <add>, %73, %cst_42 [1] : vector<8x8xf32> to vector<8xf32>
    %75 = vector.shape_cast %74 : vector<8xf32> to vector<8x1xf32>
    %cst_43 = arith.constant dense<0.000000e+00> : vector<4x1xf32>
    %76 = tpu.matmul %4, %75, %cst_43 {dimension_numbers = #tpu.dot_dimension_numbers<[1], [0], [0], [1], [0, 0, 1, 1], [], []>} : vector<4x8xf32>, vector<8x1xf32>, vector<4x1xf32> -> vector<4x1xf32>
    %cst_44 = arith.constant 1.600000e+01 : f32
    %77 = vector.broadcast %cst_44 : f32 to vector<4x1xf32>
    %78 = arith.divf %76, %77 : vector<4x1xf32>
    %cst_45 = arith.constant 9.99999974E-6 : f32
    %79 = vector.broadcast %cst_45 : f32 to vector<4x1xf32>
    %80 = arith.addf %78, %79 : vector<4x1xf32>
    %81 = math.rsqrt %80 : vector<4x1xf32>
    %cst_46 = arith.constant dense<0.000000e+00> : vector<8x1xf32>
    %82 = tpu.matmul %5, %81, %cst_46 {dimension_numbers = #tpu.dot_dimension_numbers<[1], [0], [0], [1], [0, 0, 1, 1], [], []>} : vector<8x4xf32>, vector<4x1xf32>, vector<8x1xf32> -> vector<8x1xf32>
    %83 = arith.mulf %82, %62 : vector<8x1xf32>
    %84 = vector.broadcast %83 : vector<8x1xf32> to vector<8x8xf32>
    %85 = arith.mulf %72, %84 : vector<8x8xf32>
    %86 = vector.broadcast %64 : vector<8x1xf32> to vector<8x8xf32>
    %87 = arith.addf %85, %86 : vector<8x8xf32>
    %88 = arith.negf %87 : vector<8x8xf32>
    %89 = math.exp %88 : vector<8x8xf32>
    %cst_47 = arith.constant 1.000000e+00 : f32
    %90 = vector.broadcast %cst_47 : f32 to vector<8x8xf32>
    %91 = arith.addf %90, %89 : vector<8x8xf32>
    %92 = arith.divf %90, %91 : vector<8x8xf32>
    %93 = arith.mulf %87, %92 : vector<8x8xf32>
    %c0_48 = arith.constant 0 : index
    %c0_49 = arith.constant 0 : index
    %c0_50 = arith.constant 0 : index
    %c0_51 = arith.constant 0 : index
    %94 = vector.load %arg13[%c0_48, %c0_49, %c0_50, %c0_51] : memref<1x3x8x8xf32, #tpu.memory_space<vmem>>, vector<1x3x8x8xf32>
    %95 = vector.shape_cast %94 : vector<1x3x8x8xf32> to vector<3x8x8xf32>
    %c0_52 = arith.constant 0 : index
    %c0_53 = arith.constant 0 : index
    %c0_54 = arith.constant 0 : index
    %96 = vector.load %arg14[%c0_52, %c0_53, %c0_54] : memref<1x8x1xf32, #tpu.memory_space<vmem>>, vector<1x8x1xf32>
    %97 = vector.shape_cast %96 : vector<1x8x1xf32> to vector<8x1xf32>
    %cst_55 = arith.constant 0.000000e+00 : f32
    %98 = vector.broadcast %cst_55 : f32 to vector<8x1xf32>
    %99 = vector.extract_strided_slice %93 {offsets = [0, 0], sizes = [8, 7], strides = [1, 1]} : vector<8x8xf32> to vector<8x7xf32>
    %100 = tpu.concatenate %98, %99 in 1 : vector<8x1xf32>, vector<8x7xf32> -> vector<8x8xf32>
    %101 = vector.extract_strided_slice %93 {offsets = [0, 1], sizes = [8, 7], strides = [1, 1]} : vector<8x8xf32> to vector<8x7xf32>
    %102 = tpu.concatenate %101, %98 in 1 : vector<8x7xf32>, vector<8x1xf32> -> vector<8x8xf32>
    %103 = vector.extract_strided_slice %95 {offsets = [0, 0, 0], sizes = [1, 8, 8], strides = [1, 1, 1]} : vector<3x8x8xf32> to vector<1x8x8xf32>
    %104 = vector.shape_cast %103 : vector<1x8x8xf32> to vector<8x8xf32>
    %cst_56 = arith.constant dense<0.000000e+00> : vector<8x8xf32>
    %105 = tpu.matmul %104, %100, %cst_56 {dimension_numbers = #tpu.dot_dimension_numbers<[1], [0], [0], [1], [0, 0, 1, 1], [], []>} : vector<8x8xf32>, vector<8x8xf32>, vector<8x8xf32> -> vector<8x8xf32>
    %106 = vector.extract_strided_slice %95 {offsets = [1, 0, 0], sizes = [1, 8, 8], strides = [1, 1, 1]} : vector<3x8x8xf32> to vector<1x8x8xf32>
    %107 = vector.shape_cast %106 : vector<1x8x8xf32> to vector<8x8xf32>
    %cst_57 = arith.constant dense<0.000000e+00> : vector<8x8xf32>
    %108 = tpu.matmul %107, %93, %cst_57 {dimension_numbers = #tpu.dot_dimension_numbers<[1], [0], [0], [1], [0, 0, 1, 1], [], []>} : vector<8x8xf32>, vector<8x8xf32>, vector<8x8xf32> -> vector<8x8xf32>
    %109 = arith.addf %105, %108 : vector<8x8xf32>
    %110 = vector.extract_strided_slice %95 {offsets = [2, 0, 0], sizes = [1, 8, 8], strides = [1, 1, 1]} : vector<3x8x8xf32> to vector<1x8x8xf32>
    %111 = vector.shape_cast %110 : vector<1x8x8xf32> to vector<8x8xf32>
    %cst_58 = arith.constant dense<0.000000e+00> : vector<8x8xf32>
    %112 = tpu.matmul %111, %102, %cst_58 {dimension_numbers = #tpu.dot_dimension_numbers<[1], [0], [0], [1], [0, 0, 1, 1], [], []>} : vector<8x8xf32>, vector<8x8xf32>, vector<8x8xf32> -> vector<8x8xf32>
    %113 = arith.addf %109, %112 : vector<8x8xf32>
    %114 = vector.broadcast %97 : vector<8x1xf32> to vector<8x8xf32>
    %115 = arith.addf %113, %114 : vector<8x8xf32>
    %116 = arith.addf %115, %3 : vector<8x8xf32>
    %c0_59 = arith.constant 0 : index
    %c0_60 = arith.constant 0 : index
    %117 = vector.load %arg16[%c0_59, %c0_60] : memref<8x8xf32, #tpu.memory_space<vmem>>, vector<8x8xf32>
    tpu.vector_store %arg16[%c0_59, %c0_60], %116 {strides = array<i32>} : memref<8x8xf32, #tpu.memory_space<vmem>>, vector<8x8xf32>,
    %c1_i32 = arith.constant 1 : i32
    %118 = arith.cmpi eq, %arg1, %c1_i32 : i32
    %119 = arith.extui %118 : i1 to i32
    %c0_i32_61 = arith.constant 0 : i32
    %120 = arith.cmpi ne, %119, %c0_i32_61 : i32
    scf.if %120 {
      %c0_62 = arith.constant 0 : index
      %c0_63 = arith.constant 0 : index
      %121 = vector.load %arg16[%c0_62, %c0_63] : memref<8x8xf32, #tpu.memory_space<vmem>>, vector<8x8xf32>
      %c0_64 = arith.constant 0 : index
      %c0_65 = arith.constant 0 : index
      %c0_66 = arith.constant 0 : index
      %122 = vector.load %arg15[%c0_64, %c0_65, %c0_66] : memref<1x8x8xf32, #tpu.memory_space<vmem>>, vector<1x8x8xf32>
      %123 = vector.shape_cast %122 : vector<1x8x8xf32> to vector<8x8xf32>
      %124 = vector.shape_cast %121 : vector<8x8xf32> to vector<1x8x8xf32>
      tpu.vector_store %arg15[%c0_64, %c0_65, %c0_66], %124 {strides = array<i32>} : memref<1x8x8xf32, #tpu.memory_space<vmem>>, vector<1x8x8xf32>,
    } else {
    }
    return
  }
  func.func @transform_0(%arg0: i32, %arg1: i32) -> (i32, i32, i32, i32) {
    %c0_i32 = arith.constant 0 : i32
    %c0_i32_0 = arith.constant 0 : i32
    %c0_i32_1 = arith.constant 0 : i32
    %c0_i32_2 = arith.constant 0 : i32
    return %arg0, %c0_i32, %c0_i32_0, %c0_i32_1 : i32, i32, i32, i32
  }
  func.func @transform_1(%arg0: i32, %arg1: i32) -> (i32, i32, i32) {
    %c0_i32 = arith.constant 0 : i32
    %c0_i32_0 = arith.constant 0 : i32
    %c0_i32_1 = arith.constant 0 : i32
    %c0_i32_2 = arith.constant 0 : i32
    return %c0_i32, %c0_i32_0, %c0_i32_1 : i32, i32, i32
  }
  func.func @transform_2(%arg0: i32, %arg1: i32) -> (i32, i32) {
    %c0_i32 = arith.constant 0 : i32
    %c0_i32_0 = arith.constant 0 : i32
    %c0_i32_1 = arith.constant 0 : i32
    return %c0_i32, %c0_i32_0 : i32, i32
  }
  func.func @transform_3(%arg0: i32, %arg1: i32) -> (i32, i32) {
    %c0_i32 = arith.constant 0 : i32
    %c0_i32_0 = arith.constant 0 : i32
    %c0_i32_1 = arith.constant 0 : i32
    return %c0_i32, %c0_i32_0 : i32, i32
  }
  func.func @transform_4(%arg0: i32, %arg1: i32) -> (i32, i32) {
    %c0_i32 = arith.constant 0 : i32
    %c0_i32_0 = arith.constant 0 : i32
    %c0_i32_1 = arith.constant 0 : i32
    return %c0_i32, %c0_i32_0 : i32, i32
  }
  func.func @transform_5(%arg0: i32, %arg1: i32) -> (i32, i32, i32) {
    %c0_i32 = arith.constant 0 : i32
    %c0_i32_0 = arith.constant 0 : i32
    %c0_i32_1 = arith.constant 0 : i32
    return %arg1, %c0_i32, %c0_i32_0 : i32, i32, i32
  }
  func.func @transform_6(%arg0: i32, %arg1: i32) -> (i32, i32, i32) {
    %c0_i32 = arith.constant 0 : i32
    %c0_i32_0 = arith.constant 0 : i32
    %c0_i32_1 = arith.constant 0 : i32
    return %arg1, %c0_i32, %c0_i32_0 : i32, i32, i32
  }
  func.func @transform_7(%arg0: i32, %arg1: i32) -> (i32, i32, i32, i32) {
    %c0_i32 = arith.constant 0 : i32
    %c0_i32_0 = arith.constant 0 : i32
    %c0_i32_1 = arith.constant 0 : i32
    %c0_i32_2 = arith.constant 0 : i32
    return %arg1, %c0_i32, %c0_i32_0, %c0_i32_1 : i32, i32, i32, i32
  }
  func.func @transform_8(%arg0: i32, %arg1: i32) -> (i32, i32, i32) {
    %c0_i32 = arith.constant 0 : i32
    %c0_i32_0 = arith.constant 0 : i32
    %c0_i32_1 = arith.constant 0 : i32
    return %arg1, %c0_i32, %c0_i32_0 : i32, i32, i32
  }
  func.func @transform_9(%arg0: i32, %arg1: i32) -> (i32, i32, i32) {
    %c0_i32 = arith.constant 0 : i32
    %c0_i32_0 = arith.constant 0 : i32
    %c0_i32_1 = arith.constant 0 : i32
    return %arg1, %c0_i32, %c0_i32_0 : i32, i32, i32
  }
  func.func @transform_10(%arg0: i32, %arg1: i32) -> (i32, i32, i32) {
    %c0_i32 = arith.constant 0 : i32
    %c0_i32_0 = arith.constant 0 : i32
    %c0_i32_1 = arith.constant 0 : i32
    return %arg1, %c0_i32, %c0_i32_0 : i32, i32, i32
  }
  func.func @transform_11(%arg0: i32, %arg1: i32) -> (i32, i32, i32, i32) {
    %c0_i32 = arith.constant 0 : i32
    %c0_i32_0 = arith.constant 0 : i32
    %c0_i32_1 = arith.constant 0 : i32
    %c0_i32_2 = arith.constant 0 : i32
    return %arg1, %c0_i32, %c0_i32_0, %c0_i32_1 : i32, i32, i32, i32
  }
  func.func @transform_12(%arg0: i32, %arg1: i32) -> (i32, i32, i32) {
    %c0_i32 = arith.constant 0 : i32
    %c0_i32_0 = arith.constant 0 : i32
    %c0_i32_1 = arith.constant 0 : i32
    return %arg1, %c0_i32, %c0_i32_0 : i32, i32, i32
  }
  func.func @transform_13(%arg0: i32, %arg1: i32) -> (i32, i32, i32) {
    %c0_i32 = arith.constant 0 : i32
    %c0_i32_0 = arith.constant 0 : i32
    %c0_i32_1 = arith.constant 0 : i32
    return %arg0, %c0_i32, %c0_i32_0 : i32, i32, i32
  }
}

</mosaic_0001>

<bundles_post_ra>
// kernel: tpu_custom_call.1
= control target key start
LH: loop header
LB: loop body
LE: loop exit
PB: predicated region body
PF: predicated region fallthrough
CT: control target
= control target key end

     0   :  { %s3149_s0 = inlined_call_operand.vmem [shape: f32[2,2,4,10], index: 0, kind: input, shape index: {}]   ;;  %s3150_s1 = inlined_call_operand.vmem [shape: f32[5,8,4], index: 1, kind: input, shape index: {}]   ;;  %s3151_s2 = inlined_call_operand.vmem [shape: f32[8,1], index: 2, kind: input, shape index: {}]   ;;  %s3152_s3 = inlined_call_operand.vmem [shape: f32[4,8], index: 3, kind: input, shape index: {}]   ;;  %s3153_s4 = inlined_call_operand.vmem [shape: f32[8,4], index: 4, kind: input, shape index: {}]   ;;  %s3154_s5 = inlined_call_operand.vmem [shape: f32[2,8,1], index: 5, kind: input, shape index: {}]   ;;  %s3155_s6 = inlined_call_operand.vmem [shape: f32[2,8,1], index: 6, kind: input, shape index: {}]   ;;  %s3156_s7 = inlined_call_operand.vmem [shape: f32[2,3,8,8], index: 7, kind: input, shape index: {}]   ;;  %s3157_s8 = inlined_call_operand.vmem [shape: f32[2,8,1], index: 8, kind: input, shape index: {}]   ;;  %s3158_s9 = inlined_call_operand.vmem [shape: f32[2,8,1], index: 9, kind: input, shape index: {}]   ;;  %s3159_s10 = inlined_call_operand.vmem [shape: f32[2,8,1], index: 10, kind: input, shape index: {}]   ;;  %s3160_s11 = inlined_call_operand.vmem [shape: f32[2,3,8,8], index: 11, kind: input, shape index: {}]   ;;  %s3161_s12 = inlined_call_operand.vmem [shape: f32[2,8,1], index: 12, kind: input, shape index: {}]   ;;  %s3162_s13 = inlined_call_operand.hbm [shape: f32[2,8,8], index: 13, kind: output, shape index: {}]  }
   0x1   :  { %3177 = sst [smem:[#allocation18_spill]] %s3149_s0 }
   0x2   :  { %3178 = sst [smem:[#allocation19_spill]] %s3152_s3 }
   0x3   :  { %3179 = sst [smem:[#allocation20_spill]] %s3153_s4 }
   0x4   :  { %3180 = sst [smem:[#allocation21_spill]] %s3162_s13 }
   0x5   :  { %18 = vsyncpa [#allocation4], 0 }
   0x6   :  { %20 = vsyncpa [#allocation4 + $0x1], 0  ;;  %s2807_s25 = smov 0   ;;  %s2809_s26 = smov 0  }
   0x7   :  { %s2811_s27 = smov 0   ;;  %s2813_s28 = smov 0  }
   0x8   :  { %s2815_s29 = smov 0   ;;  %s2817_s30 = smov 0  }
   0x9   :  { %s2819_s14 = smov 0   ;;  %s2821_s15 = smov 0  }
   0xa LB: > { %3181 = sst [smem:[#allocation6_spill]] %s2696_s25  ;;  %s2337_s16 = sadd.s32 4294967295, %s2724_s15   ;;  %s2724_s15 = sphi %s2821_s15, %s26_s15   ;;  %s2720_s14 = sphi %s2819_s14, %s3216_s14   ;;  %s2716_s30 = sphi %s2817_s30, %s3215_s30   ;;  %s2712_s29 = sphi %s2815_s29, %s3214_s29   ;;  %s2708_s28 = sphi %s2813_s28, %s3213_s28   ;;  %s2704_s27 = sphi %s2811_s27, %s3212_s27   ;;  %s2700_s26 = sphi %s2809_s26, %s3211_s26   ;;  %s2696_s25 = sphi %s2807_s25, %s3210_s25  }
   0xb   : > { %3182 = sst [smem:[#allocation7_spill]] %s2700_s26  ;;  %s2338_s17 = sadd.s32 4294967294, %s2724_s15  }
   0xc   : > { %3183 = sst [smem:[#allocation8_spill]] %s2704_s27  ;;  %s35_s18 = sadd.s32 1, %s2716_s30 }
   0xd   : > { %3184 = sst [smem:[#allocation9_spill]] %s2712_s29  ;;  %p36_p0 = scmp.ge.s32.totalorder %s35_s18, 2 }
   0xe   : > { %3185 = sst [smem:[#allocation10_spill]] %s2716_s30  ;;  %s38_s19 = sadd.s32 1, %s2720_s14 }
   0xf   : > { %3186 = sst [smem:[#allocation11_spill]] %s2720_s14  ;;  %p373_p1 = scmp.ne.s32.totalorder %s2704_s27, %s2700_s26 }
  0x10   : > { %3187 = sst [smem:[#allocation12_spill]] %s2724_s15  ;;  %p374_p2 = scmp.eq.s32.totalorder %s2337_s16, 3 }
  0x11   : > { %s3218_s18 = smov (%p36_p0, %s35_s18), 0  ;;  %s3220_s19 = smov (!%p36_p0, %s38_s19), %s2720_s14 }
  0x12   : > { %3188 = sst [smem:[#allocation13_spill]] %s3218_s18  ;;  %p2856_p3 = por %p374_p2, %p373_p1 }
  0x13   : > { %p379_p4 = scmp.ne.s32.totalorder %s2700_s26, %s2696_s25  ;;  %p40_p5 = scmp.ge.s32.totalorder %s3220_s19, 2 }
  0x14   : > { %s3189_s20 = scalar_select %p2856_p3, 1, 0 }
  0x15   : > { %p380_p6 = scmp.eq.s32.totalorder %s2338_s17, 3  ;;  %p2341_p7 = scmp.ge.s32.totalorder %s2724_s15, 1 }
  0x16   : > { %3190 = sst [smem:[#allocation14_spill]] %s3189_s20  ;;  %p476_p8 = scmp.lt.s32.totalorder %s2724_s15, 5 }
  0x17   : > { %s3222_s19 = smov (%p40_p5, %s3220_s19), 0  ;;  %p2866_p9 = por %p380_p6, %p379_p4 }
  0x18   : > { %3191 = sst [smem:[#allocation15_spill]] %s3222_s19  ;;  %p477_p10 = pnand %p2341_p7, %p476_p8 }
  0x19   : > { %s3192_s21 = scalar_select %p2866_p9, 1, 0 }
  0x1a   : > { %s360_s22 = ssub.s32 %s2720_s14, %s3222_s19  ;;  %s363_s23 = sadd.s32 1, %s2704_s27 }
  0x1b   : > { %3193 = sst [smem:[#allocation16_spill]] %s3192_s21  ;;  %p361_p11 = scmp.eq.s32.totalorder %s360_s22, 0 }
  0x1c   : > { %480 = sbr.rel (%p477_p10) target bundleno = 3778 (0xec2), region = 72  ;;  %s3168_s16 = sand.u32 (!%p477_p10), 1, %s2700_s26  }
  0x1d   : > { %s2874_s24 = scalar_select %p361_p11, %s2704_s27, %s363_s23  }
  0x1e   : > { %p554_p12 = scmp.lt.s32.totalorder (!%p477_p10), %s2712_s29, 1  ;;  %s2880_s17 = sshll.u32 (!%p477_p10), %s3168_s16, 3 }
  0x1f   : > { %3194 = sst [smem:[#allocation17_spill]] %s2874_s24  ;;  %p559_p13 = scmp.lt.s32.totalorder (!%p477_p10), %s2708_s28, 1 }
  0x20   : > { %s3195_s0 = sld [smem:[#allocation18_spill]] (!%p477_p10)  ;;  %p2353_p0 = scmp.ne.s32.totalorder (!%p477_p10), %s2708_s28, 0 }
  0x21   : > { %s555_s18 = scalar_select %p554_p12, %s2712_s29, 1 }
  0x22   : > { %s560_s19 = scalar_select %p559_p13, %s2708_s28, 1 }
  0x23   : > { %s2400_s14 = sshll.u32 %s555_s18, 3  ;;  %s2726_s23 = smov (!%p2353_p0), 127  }
  0x24   : > { %s2888_s24 = sshll.u32 %s560_s19, 3  ;;  %s2534_s13 = smul.u32 24, %s560_s19 }
  0x25   : > { %s566_s18 = scalar_lea.vmem %s3155_s6, %s2888_s24  ;;  %s579_s26 = scalar_lea.vmem %s3158_s9, %s2888_s24 }
  0x26   : > { %s558_s30 = scalar_lea.vmem %s3195_s0, %s2400_s14  ;;  %s583_s29 = scalar_lea.vmem %s3159_s10, %s2888_s24 }
  0x27   : > { %s2913_s16 = scalar_lea.vmem %s3156_s7, %s2534_s13  ;;  %s2918_s19 = scalar_lea.vmem %s3160_s11, %s2534_s13 }
  0x28   : > { %s592_s14 = scalar_lea.vmem %s3161_s12, %s2888_s24  ;;  %s553_s0 = scalar_lea.vmem [#allocation3], %s2880_s17 }
  0x29   : > { %596 = sbr.rel (%p2353_p0) target bundleno = 367 (0x16f), region = 76  ;;  %s2727_s27 = smov (!%p2353_p0), 126  }
  0x2e   : > { %v597_v0 = vld [vmem:[%s558_s30] sm:$0xf]  ;;  %vm607_vm0 = vcmask 1043456   ;;  %v2355_v1 = vld [vmem:[%s3150_s1 + $0x8] sm:$0xff]  ;;  %vm603_vm1 = vcmask 31744   ;;  %v2728_v3 = vmov 0.0  }
  0x2f   : > { %759 = vrot.lane.b32.xlu0 %v597_v0, %s2726_s23  ;;  %919 = vrot.lane.b32.xlu1 %v597_v0, %s2727_s27  ;;  %v2354_v2 = vld [vmem:[%s558_s30 + $0x4] sm:$0xf]  ;;  %vm2729_vm2 = vmmov 0   ;;  %v2730_v6 = vmov 0   ;;  %v2360_v7 = vld [vmem:[%s3150_s1 + $0x10] sm:$0xff]  ;;  %vm1004_vm3 = vcmask 64512  }
  0x30   : > { %2439 = vmatprep.subr.mxu0 %v2728_v3  ;;  %2441 = vmatprep.mubr.msk.f32.mxu0 %vm2729_vm2, %v2728_v3  ;;  %v598_v4 = vld [vmem:[%s3150_s1] sm:$0xff]  ;;  %v2363_v10 = vld [vmem:[%s3150_s1 + $0x18] sm:$0xff] }
  0x31   : > { %2440 = vmatpush3.msk.msra.mxu0 %vm607_vm0, %v2354_v2  ;;  %2444 = vmatprep.subr.mxu1 %v2728_v3  ;;  %v997_v5 = vld [vmem:[%s3151_s2] sm:$0xff] }
  0x32   : > { %2449 = vmatprep.subr.mxu0 %v2728_v3  ;;  %2442 = vmatmul.mubr.msk.f32.vlgmr.msra.gmra.mxu0 %vm603_vm1, %v2355_v1  ;;  %v2366_v11 = vld [vmem:[%s3150_s1 + $0x20] sm:$0xff] }
  0x33   : > { %839 = vrot.lane.b32.xlu0 %v2354_v2, %s2726_s23  ;;  %2445 = vmatpush3.msk.msra.mxu1 %vm607_vm0, %v597_v0 }
  0x34   : > { %2446 = vmatprep.mubr.msk.f32.mxu1 %vm2729_vm2, %v2728_v3  ;;  %2451 = vmatprep.mubr.msk.f32.mxu0 %vm2729_vm2, %v2728_v3 }
  0x35   : > { %2447 = vmatmul.mubr.msk.f32.vlgmr.msra.gmra.mxu1 %vm603_vm1, %v598_v4  ;;  %2454 = vmatprep.subr.mxu1 %v2728_v3 }
  0x36   : > { %2456 = vmatprep.mubr.msk.f32.mxu1 %vm2729_vm2, %v2728_v3  ;;  %2616 = vset.pattern.permute.xlu1 %v2730_v6 }
  0x37   : > { %1000 = vperm.xlu1 %2616, %v997_v5   ;;  %2617 = vset.pattern.permute.xlu0 %v2730_v6 }
  0xa1   : > { %v760_v8 = vpop.permute.xlu0 %759  ;;  %v920_v9 = vpop.permute.xlu1 %919 }
  0xa2   : > { %2450 = vmatpush3.msk.msra.mxu0 %vm607_vm0, %v760_v8 }
  0xa3   : > { %2452 = vmatmul.mubr.msk.f32.vlgmr.msra.gmra.mxu0 %vm603_vm1, %v2360_v7  ;;  %2459 = vmatprep.subr.mxu0 %v2728_v3 }
  0xa4   : > { %2460 = vmatpush3.msk.msra.mxu0 %vm607_vm0, %v920_v9  ;;  %2461 = vmatprep.mubr.msk.f32.mxu0 %vm2729_vm2, %v2728_v3 }
  0xa5   : > { %v840_v12 = vpop.permute.xlu0 %839 }
  0xa6   : > { %2455 = vmatpush3.msk.msra.mxu1 %vm607_vm0, %v840_v12 }
  0xa7   : > { %2457 = vmatmul.mubr.msk.f32.vlgmr.msra.gmra.mxu1 %vm603_vm1, %v2363_v10  ;;  %2462 = vmatmul.mubr.msk.f32.vlgmr.msra.gmra.mxu0 %vm603_vm1, %v2366_v11 }
  0xb2   : > { %v1001_v24 = vpop.permute.xlu1 %1000 }
  0xf2   : > { %v677_v13 = vpop.f32.mrf.mxu0 }
  0xf4   : > { %v2443_v14 = vpop.f32.mrf.mxu0 }
  0xf5   : > { %v753_v15 = vpop.f32.mrf.mxu1 }
  0xf6   : > { %v754_v16 = vadd.f32 %v753_v15, %v677_v13 }
  0xf7   : > { %v2448_v17 = vpop.f32.mrf.mxu1 }
 0x163   : > { %v832_v18 = vpop.f32.mrf.mxu0 }
 0x164   : > { %v836_v20 = vadd.f32 %v832_v18, %v754_v16 }
 0x165   : > { %v2453_v19 = vpop.f32.mrf.mxu0 }
 0x167   : > { %v912_v21 = vpop.f32.mrf.mxu1  ;;  %v992_v22 = vpop.f32.mrf.mxu0 }
 0x168   : > { %v916_v23 = vadd.f32 %v912_v21, %v836_v20 }
 0x169   : > { %v2458_v25 = vpop.f32.mrf.mxu1  ;;  %v2463_v26 = vpop.f32.mrf.mxu0 }
 0x16a   : > { %v996_v27 = vadd.f32 %v992_v22, %v916_v23 }
 0x16c   : > { %v1003_v28 = vadd.f32 %v1001_v24, %v996_v27 }
 0x16e   : > { %1005 = vst.msk [vmem:[#allocation2] sm:$0xff] %vm1004_vm3, %v1003_v28 }
 0x16f PF: > { %vm1011_vm4 = vcmask 64512   ;;  %v2731_v31 = vmov 0.0   ;;  %vm2732_vm5 = vmmov 0   ;;  %s3196_s21 = sld [smem:[#allocation19_spill]]  ;;  %v2733_v34 = vmov 0   ;;  %s3198_s23 = scalar_lea.vmem %s3154_s5, %s2888_s24  ;;  %v1010_v55 = vld [vmem:[%s566_s18] sm:$0xff] }
 0x170   : > { %2464 = vmatprep.subr.mxu0 %v2731_v31  ;;  %2469 = vmatprep.subr.mxu1 %v2731_v31  ;;  %vm1094_vm6 = vcmask 1043456   ;;  %s3197_s15 = sld [smem:[#allocation20_spill]]  ;;  %vm1090_vm7 = vcmask 31744   ;;  %v1009_v51 = vld [vmem:[%s3198_s23] sm:$0xff]  ;;  %v1345_v1 = vld [vmem:[%s2913_s16 + $0x8] sm:$0xff]  ;;  %s2734_s4 = smov 1  }
 0x171   : > { %2466 = vmatprep.mubr.msk.f32.mxu0 %vm2732_vm5, %v2731_v31  ;;  %2471 = vmatprep.mubr.msk.f32.mxu1 %vm2732_vm5, %v2731_v31  ;;  %s2735_s18 = smov 127   ;;  %s3199_s30 = scalar_lea.vmem %s3157_s8, %s2888_s24  ;;  %vm1352_vm8 = vcmask 7168   ;;  %v1344_v4 = vld [vmem:[%s2913_s16] sm:$0xff]  ;;  %vm1357_vm10 = vcmask 56320   ;;  %v1346_v6 = vld [vmem:[%s2913_s16 + $0x10] sm:$0xff] }
 0x172   : > { %2618 = vset.pattern.permute.xlu0 %v2733_v34  ;;  %2619 = vset.pattern.permute.xlu1 %v2733_v34  ;;  %v1347_v2 = vld [vmem:[%s3199_s30] sm:$0xff]  ;;  %vm3025_vm9 = vmneg %vm1352_vm8  ;;  %p2395_p1 = scmp.ne.s32.totalorder %s2708_s28, 1 }
 0x175   : > { %v2959_v29 = vld [vmem:[#allocation2] sm:$0xff] }
 0x176   : > { %v1012_v30 = vsel %vm1011_vm4, %v2959_v29, 0.0  ;;  %v2972_v32 = vld [vmem:[%s3196_s21] sm:$0xf] }
 0x177   : > { %1013 = vadd.xlane.f32.xlu0 %v1012_v30  ;;  %v2982_v37 = vld [vmem:[%s3197_s15] sm:$0xff] }
 0x178   : > { %v1586_v30 = vld [vmem:[%s583_s29] sm:$0xff] }
 0x200   : > { %v1014_v33 = vpop.xlane.xlu0 %1013 }
 0x201   : > { %2465 = vmatpush3.msra.mxu0 %v1014_v33 }
 0x202   : > { %2467 = vmatmul.mubr.msk.f32.vlgmr.msra.gmra.mxu0 %vm1011_vm4, %v2972_v32  ;;  %2474 = vmatprep.subr.mxu0 %v2731_v31 }
 0x203   : > { %2476 = vmatprep.mubr.msk.f32.mxu0 %vm2732_vm5, %v2731_v31 }
 0x2c2   : > { %v1084_v35 = vpop.f32.mrf.mxu0 }
 0x2c3   : > { %v1089_v36 = vmul.f32 0.0625, %v1084_v35 }
 0x2c4   : > { %v2468_v38 = vpop.f32.mrf.mxu0 }
 0x2c5   : > { %2470 = vmatpush3.msk.msra.mxu1 %vm1094_vm6, %v1089_v36 }
 0x2c6   : > { %2472 = vmatmul.mubr.msk.f32.vlgmr.msra.gmra.mxu1 %vm1090_vm7, %v2982_v37  ;;  %2479 = vmatprep.subr.mxu1 %v2731_v31 }
 0x2c7   : > { %2481 = vmatprep.mubr.msk.f32.mxu1 %vm2732_vm5, %v2731_v31 }
 0x386   : > { %v1164_v39 = vpop.f32.mrf.mxu1 }
 0x387   : > { %1170 = vperm.xlu0 %2618, %v1164_v39  }
 0x388   : > { %v2473_v40 = vpop.f32.mrf.mxu1 }
 0x402   : > { %v1171_v41 = vpop.permute.xlu0 %1170 }
 0x403   : > { %v1173_v42 = vsub.f32 %v2959_v29, %v1171_v41 }
 0x405   : > { %v1174_v43 = vmul.f32 %v1173_v42, %v1173_v42 }
 0x407   : > { %v1175_v44 = vsel %vm1011_vm4, %v1174_v43, 0.0 }
 0x408   : > { %1176 = vadd.xlane.f32.xlu1 %v1175_v44 }
 0x491   : > { %v1177_v45 = vpop.xlane.xlu1 %1176 }
 0x492   : > { %2475 = vmatpush3.msra.mxu0 %v1177_v45 }
 0x493   : > { %2477 = vmatmul.mubr.msk.f32.vlgmr.msra.gmra.mxu0 %vm1011_vm4, %v2972_v32  ;;  %2484 = vmatprep.subr.mxu0 %v2731_v31 }
 0x494   : > { %2486 = vmatprep.mubr.msk.f32.mxu0 %vm2732_vm5, %v2731_v31 }
 0x553   : > { %v1244_v46 = vpop.f32.mrf.mxu0 }
 0x554   : > { %v1248_v47 = vmul.f32 0.0625, %v1244_v46 }
 0x555   : > { %v2478_v48 = vpop.f32.mrf.mxu0 }
 0x556   : > { %v1249_v49 = vadd.f32 1e-05, %v1248_v47 }
 0x558   : > { %2620 = vrsqrt.f32 %v1249_v49 }
 0x565   : > { %v2621_v50 = vpop.eup %2620 }
 0x566   : > { %2480 = vmatpush3.msk.msra.mxu1 %vm1094_vm6, %v2621_v50 }
 0x567   : > { %2482 = vmatmul.mubr.msk.f32.vlgmr.msra.gmra.mxu1 %vm1090_vm7, %v2982_v37  ;;  %2489 = vmatprep.subr.mxu1 %v2731_v31 }
 0x568   : > { %2491 = vmatprep.mubr.msk.f32.mxu1 %vm2732_vm5, %v2731_v31 }
 0x627   : > { %v1320_v52 = vpop.f32.mrf.mxu1 }
 0x628   : > { %v1324_v53 = vmul.f32 %v1320_v52, %v1009_v51  ;;  %v1911_v51 = vld [vmem:[%s2918_s19 + $0x8] sm:$0xff]  ;;  %v1913_v52 = vld [vmem:[%s592_s14] sm:$0xff] }
 0x629   : > { %v2483_v54 = vpop.f32.mrf.mxu1 }
 0x62a   : > { %1327 = vperm.xlu1 %2619, %v1324_v53   ;;  %v1910_v53 = vld [vmem:[%s2918_s19] sm:$0xff] }
 0x62e   : > { %1333 = vperm.xlu1 %2619, %v1010_v55   ;;  %v1912_v55 = vld [vmem:[%s2918_s19 + $0x10] sm:$0xff] }
 0x6a5   : > { %v1328_v56 = vpop.permute.xlu1 %1327 }
 0x6a6   : > { %v1330_v57 = vmul.f32 %v1328_v56, %v1173_v42 }
 0x6a9   : > { %v1334_v58 = vpop.permute.xlu1 %1333 }
 0x6aa   : > { %v1336_v59 = vadd.f32 %v1334_v58, %v1330_v57 }
 0x6ac   : > { %v2375_v60 = vmul.f32 -1.442695, %v1336_v59 }
 0x6ae   : > { %2622 = vpow2.f32 %v2375_v60 }
 0x6bb   : > { %v2623_v61 = vpop.eup %2622 }
 0x6bc   : > { %v1340_v62 = vadd.f32 1.0, %v2623_v61 }
 0x6be   : > { %2624 = vrcp.f32 %v1340_v62 }
 0x6cb   : > { %v2625_v63 = vpop.eup %2624 }
 0x6cc   : > { %v1343_v0 = vmul.f32 %v2625_v63, %v1336_v59 }
 0x6ce   : > { %1349 = vrot.lane.b32.xlu1 %v1343_v0, %s2734_s4  ;;  %2485 = vmatpush3.msra.mxu0 %v1343_v0 }
 0x6cf   : > { %2487 = vmatmul.mubr.msk.f32.vlgmr.msra.gmra.mxu0 %vm1011_vm4, %v1345_v1  ;;  %2494 = vmatprep.subr.mxu0 %v2731_v31 }
 0x6d0   : > { %2496 = vmatprep.mubr.msk.f32.mxu0 %vm2732_vm5, %v2731_v31 }
 0x6d2   : > { %1354 = vrot.lane.b32.xlu1 %v1343_v0, %s2735_s18 }
 0x6d6   : > { %1581 = vperm.xlu1 %2619, %v1347_v2  }
 0x740   : > { %v1350_v5 = vpop.permute.xlu1 %1349 }
 0x741   : > { %2490 = vmatpush3.msk.msra.mxu1 %vm3025_vm9, %v1350_v5 }
 0x742   : > { %2492 = vmatmul.mubr.msk.f32.vlgmr.msra.gmra.mxu1 %vm1011_vm4, %v1344_v4  ;;  %2499 = vmatprep.subr.mxu1 %v2731_v31 }
 0x743   : > { %2501 = vmatprep.mubr.msk.f32.mxu1 %vm2732_vm5, %v2731_v31 }
 0x744   : > { %v1355_v7 = vpop.permute.xlu1 %1354 }
 0x745   : > { %2495 = vmatpush3.msk.msra.mxu0 %vm1357_vm10, %v1355_v7 }
 0x746   : > { %2497 = vmatmul.mubr.msk.f32.vlgmr.msra.gmra.mxu0 %vm1011_vm4, %v1346_v6  ;;  %2504 = vmatprep.subr.mxu0 %v2731_v31 }
 0x747   : > { %2506 = vmatprep.mubr.msk.f32.mxu0 %vm2732_vm5, %v2731_v31 }
 0x751   : > { %v1582_v15 = vpop.permute.xlu1 %1581 }
 0x78f   : > { %v1428_v8 = vpop.f32.mrf.mxu0 }
 0x791   : > { %v2488_v9 = vpop.f32.mrf.mxu0 }
 0x802   : > { %v1501_v10 = vpop.f32.mrf.mxu1 }
 0x803   : > { %v1502_v12 = vadd.f32 %v1501_v10, %v1428_v8 }
 0x804   : > { %v2493_v11 = vpop.f32.mrf.mxu1 }
 0x806   : > { %v1574_v13 = vpop.f32.mrf.mxu0 }
 0x807   : > { %v1578_v14 = vadd.f32 %v1574_v13, %v1502_v12 }
 0x808   : > { %v2498_v16 = vpop.f32.mrf.mxu0 }
 0x809   : > { %v1584_v17 = vadd.f32 %v1582_v15, %v1578_v14 }
 0x80b   : > { %v1587_v18 = vsel %vm1011_vm4, %v1584_v17, 0.0 }
 0x80c   : > { %1588 = vadd.xlane.f32.xlu1 %v1587_v18 }
 0x895   : > { %v1589_v19 = vpop.xlane.xlu1 %1588 }
 0x896   : > { %2500 = vmatpush3.msra.mxu1 %v1589_v19 }
 0x897   : > { %2502 = vmatmul.mubr.msk.f32.vlgmr.msra.gmra.mxu1 %vm1011_vm4, %v2972_v32  ;;  %2509 = vmatprep.subr.mxu1 %v2731_v31 }
 0x898   : > { %2511 = vmatprep.mubr.msk.f32.mxu1 %vm2732_vm5, %v2731_v31 }
 0x957   : > { %v1656_v20 = vpop.f32.mrf.mxu1 }
 0x958   : > { %v1660_v21 = vmul.f32 0.0625, %v1656_v20 }
 0x959   : > { %v2503_v22 = vpop.f32.mrf.mxu1 }
 0x95a   : > { %2505 = vmatpush3.msk.msra.mxu0 %vm1094_vm6, %v1660_v21 }
 0x95b   : > { %2507 = vmatmul.mubr.msk.f32.vlgmr.msra.gmra.mxu0 %vm1090_vm7, %v2982_v37  ;;  %2514 = vmatprep.subr.mxu0 %v2731_v31 }
 0x95c   : > { %2516 = vmatprep.mubr.msk.f32.mxu0 %vm2732_vm5, %v2731_v31 }
 0xa1b   : > { %v1730_v23 = vpop.f32.mrf.mxu0 }
 0xa1c   : > { %1736 = vperm.xlu0 %2618, %v1730_v23  }
 0xa1d   : > { %v2508_v24 = vpop.f32.mrf.mxu0 }
 0xa97   : > { %v1737_v25 = vpop.permute.xlu0 %1736 }
 0xa98   : > { %v1739_v26 = vsub.f32 %v1584_v17, %v1737_v25 }
 0xa9a   : > { %v1740_v27 = vmul.f32 %v1739_v26, %v1739_v26 }
 0xa9c   : > { %v1741_v28 = vsel %vm1011_vm4, %v1740_v27, 0.0 }
 0xa9d   : > { %1742 = vadd.xlane.f32.xlu0 %v1741_v28 }
 0xab3   : > { %1899 = vperm.xlu0 %2618, %v1586_v30  }
 0xb26   : > { %v1743_v33 = vpop.xlane.xlu0 %1742 }
 0xb27   : > { %2510 = vmatpush3.msra.mxu1 %v1743_v33 }
 0xb28   : > { %2512 = vmatmul.mubr.msk.f32.vlgmr.msra.gmra.mxu1 %vm1011_vm4, %v2972_v32  ;;  %2519 = vmatprep.subr.mxu1 %v2731_v31  ;;  %v1585_v32 = vld [vmem:[%s579_s26] sm:$0xff] }
 0xb29   : > { %2521 = vmatprep.mubr.msk.f32.mxu1 %vm2732_vm5, %v2731_v31 }
 0xb2e   : > { %v1900_v45 = vpop.permute.xlu0 %1899 }
 0xbe8   : > { %v1810_v34 = vpop.f32.mrf.mxu1 }
 0xbe9   : > { %v1814_v35 = vmul.f32 0.0625, %v1810_v34 }
 0xbea   : > { %v2513_v36 = vpop.f32.mrf.mxu1 }
 0xbeb   : > { %v1815_v38 = vadd.f32 1e-05, %v1814_v35 }
 0xbed   : > { %2626 = vrsqrt.f32 %v1815_v38 }
 0xbfa   : > { %v2627_v39 = vpop.eup %2626 }
 0xbfb   : > { %2515 = vmatpush3.msk.msra.mxu0 %vm1094_vm6, %v2627_v39 }
 0xbfc   : > { %2517 = vmatmul.mubr.msk.f32.vlgmr.msra.gmra.mxu0 %vm1090_vm7, %v2982_v37  ;;  %2524 = vmatprep.subr.mxu0 %v2731_v31 }
 0xbfd   : > { %2526 = vmatprep.mubr.msk.f32.mxu0 %vm2732_vm5, %v2731_v31 }
 0xcbc   : > { %v1886_v40 = vpop.f32.mrf.mxu0 }
 0xcbd   : > { %v1890_v41 = vmul.f32 %v1886_v40, %v1585_v32 }
 0xcbe   : > { %v2518_v42 = vpop.f32.mrf.mxu0 }
 0xcbf   : > { %1893 = vperm.xlu1 %2619, %v1890_v41  }
 0xd3a   : > { %v1894_v43 = vpop.permute.xlu1 %1893 }
 0xd3b   : > { %v1896_v44 = vmul.f32 %v1894_v43, %v1739_v26 }
 0xd3d   : > { %v1902_v37 = vadd.f32 %v1900_v45, %v1896_v44 }
 0xd3f   : > { %v2388_v46 = vmul.f32 -1.442695, %v1902_v37 }
 0xd41   : > { %2628 = vpow2.f32 %v2388_v46 }
 0xd4e   : > { %v2629_v47 = vpop.eup %2628 }
 0xd4f   : > { %v1906_v48 = vadd.f32 1.0, %v2629_v47 }
 0xd51   : > { %2630 = vrcp.f32 %v1906_v48 }
 0xd5e   : > { %v2631_v49 = vpop.eup %2630 }
 0xd5f   : > { %v1909_v50 = vmul.f32 %v2631_v49, %v1902_v37 }
 0xd61   : > { %1915 = vrot.lane.b32.xlu1 %v1909_v50, %s2734_s4  ;;  %2520 = vmatpush3.msra.mxu1 %v1909_v50 }
 0xd62   : > { %2522 = vmatmul.mubr.msk.f32.vlgmr.msra.gmra.mxu1 %vm1011_vm4, %v1911_v51  ;;  %2529 = vmatprep.subr.mxu1 %v2731_v31 }
 0xd63   : > { %2531 = vmatprep.mubr.msk.f32.mxu1 %vm2732_vm5, %v2731_v31 }
 0xd65   : > { %1919 = vrot.lane.b32.xlu1 %v1909_v50, %s2735_s18 }
 0xd69   : > { %2145 = vperm.xlu1 %2619, %v1913_v52  }
 0xdd3   : > { %v1916_v54 = vpop.permute.xlu1 %1915 }
 0xdd4   : > { %2525 = vmatpush3.msk.msra.mxu0 %vm3025_vm9, %v1916_v54 }
 0xdd5   : > { %2527 = vmatmul.mubr.msk.f32.vlgmr.msra.gmra.mxu0 %vm1011_vm4, %v1910_v53 }
 0xdd7   : > { %v1920_v56 = vpop.permute.xlu1 %1919 }
 0xdd8   : > { %2530 = vmatpush3.msk.msra.mxu1 %vm1357_vm10, %v1920_v56 }
 0xdd9   : > { %2532 = vmatmul.mubr.msk.f32.vlgmr.msra.gmra.mxu1 %vm1011_vm4, %v1912_v55 }
 0xde4   : > { %v2146_v63 = vpop.permute.xlu1 %2145 }
 0xe22   : > { %v1992_v31 = vpop.f32.mrf.mxu1 }
 0xe24   : > { %v2523_v57 = vpop.f32.mrf.mxu1 }
 0xe95   : > { %v2065_v58 = vpop.f32.mrf.mxu0 }
 0xe96   : > { %v2066_v60 = vadd.f32 %v2065_v58, %v1992_v31 }
 0xe97   : > { %v2528_v59 = vpop.f32.mrf.mxu0 }
 0xe99   : > { %v2138_v61 = vpop.f32.mrf.mxu1 }
 0xe9a   : > { %v2142_v62 = vadd.f32 %v2138_v61, %v2066_v60 }
 0xe9b   : > { %v2533_v0 = vpop.f32.mrf.mxu1 }
 0xe9c   : > { %v2148_v1 = vadd.f32 %v2146_v63, %v2142_v62  ;;  %2154 = sbr.rel (%p2395_p1) target bundleno = 3753 (0xea9), region = 80 }
 0xe9e   : > { %v2149_v2 = vadd.f32 %v2148_v1, %v2959_v29 }
 0xea0   : > { %2150 = vst.msk [vmem:[#allocation2] sm:$0xff] %vm1011_vm4, %v2149_v2 }
 0xea7   : > { %v2155_v3 = vld [vmem:[#allocation2] sm:$0xff] }
 0xea8   : > { %2156 = vst.msk [vmem:[%s553_s0] sm:$0xff] %vm1011_vm4, %v2155_v3 }
 0xea9 PF: > { %s3202_s24 = sld [smem:[#allocation9_spill]]  ;;  %s2171_s18 = sshll.u32 %s553_s0, 4  ;;  %s2172_s18 = int_to_ptr.vmem [resolvable:$true] %s2171_s18 }
 0xeaa   : > { %s3203_s14 = sld [smem:[#allocation7_spill]]  ;;  %s2632_s21 = scalar_lea.vmem %s2172_s18, 128 }
 0xeab   : > { %s3205_s3 = sld [smem:[#allocation21_spill]]  ;;  %p2633_p2 = scmp.ne.s32.totalorder %s2172_s18, %s2632_s21 }
 0xeac   : > { %s2736_s30 = smov [#allocation3]  }
 0xead   : > { %p2634_p4 = pnand %p2633_p2, %p2856_p3  ;;  %s2636_s16 = sshll.u32 %s2736_s30, 4  ;;  %s2637_s16 = int_to_ptr.vmem [resolvable:$false] %s2636_s16 }
 0xeae   : > { %s2638_s25 = scalar_lea.vmem %s2637_s16, 256  ;;  %p2639_p6 = scmp.lt.s32.totalorder %s2172_s18, %s2637_s16 }
 0xeaf   : > { %s2397_s22 = sshll.u32 %s3202_s24, 7  ;;  %p2635_p5 = pneg %p2634_p4 }
 0xeb0   : > { %s3206_s28 = sand.u32 1, %s3203_s14   ;;  %p2640_p7 = scmp.lt.s32.totalorder %s2638_s25, %s2632_s21 }
 0xeb1   : > { %s2169_s4 = scalar_lea.hbm %s3205_s3, %s2397_s22  ;;  %s2158_s13 = scalar_lea.sflag [#allocation4], %s3206_s28 }
 0xeb2   : > { %p2641_p8 = por %p2640_p7, %p2639_p6 }
 0xeb4   : > { %p2642_p10 = pnand %p2641_p8, %p2635_p5 }
 0xeb6   : > { %2645 = shalt.err (!%p2642_p10)
}
 0xeb7   : > { %s2646_s29 = scalar_lea.hbm %s2169_s4, 128  ;;  %s2650_s15 = scalar_lea.hbm %s3205_s3, 256 }
 0xeb8   : > { %p2647_p11 = scmp.ne.s32.totalorder %s2169_s4, %s2646_s29  ;;  %p2651_p0 = scmp.lt.s32.totalorder %s2169_s4, %s3205_s3 }
 0xeb9   : > { %p2652_p1 = scmp.lt.s32.totalorder %s2650_s15, %s2646_s29 }
 0xeba   : > { %p2648_p12 = pnand %p2647_p11, %p2856_p3 }
 0xebb   : > { %p2653_p2 = por %p2652_p1, %p2651_p0 }
 0xebc   : > { %p2649_p13 = pneg %p2648_p12 }
 0xebe   : > { %p2654_p4 = pnand %p2653_p2, %p2649_p13 }
 0xec0   : > { %2657 = shalt.err (!%p2654_p4)
}
 0xec1   : > { %2535 = dma.vmem_to_hbm [thread:$0]  (%p2856_p3), %s2172_s18, 128, %s2169_s4, %s2158_s13  }
 0xec2 PF: > { %s3207_s24 = sld [smem:[#allocation12_spill]] }
 0xec3   : > { %s3208_s14 = sld [smem:[#allocation6_spill]] }
 0xec8   : > { %p2541_p5 = scmp.ge.s32.totalorder %s3207_s24, 2 }
 0xec9   : > { %s2183_s23 = sand.u32 1, %s3208_s14  }
 0xeca   : > { %p2538_p6 = pnand %p2541_p5, %p2866_p9  ;;  %s2184_s27 = scalar_lea.sflag [#allocation4], %s2183_s23 }
 0xecc   : > { %p2539_p7 = pneg %p2538_p6 }
 0xece   : > { %2691 = dma.done.wait (%p2539_p7), %s2184_s27, 128  }
 0xecf   : > { %2693 = vsyncadd (%p2539_p7), %s2184_s27, 4294967168  ;;  %s26_s15 = sadd.s32 1, %s3207_s24   ;;  %s3210_s25 = sld [smem:[#allocation7_spill]] }
 0xed0   : > { %p23_p8 = scmp.ge.s32.totalorder %s26_s15, 6   ;;  %s3211_s26 = sld [smem:[#allocation8_spill]] }
 0xed1   : > { %s3212_s27 = sld [smem:[#allocation17_spill]] }
 0xed2   : > { %s3213_s28 = sld [smem:[#allocation10_spill]]  ;;  %25 = sbr.rel (!%p23_p8) target bundleno = 10 (0xa), region = 144 }
 0xed3   : > { %s3214_s29 = sld [smem:[#allocation11_spill]] }
 0xed4   : > { %s3215_s30 = sld [smem:[#allocation13_spill]] }
 0xed5   : > { %s3216_s14 = sld [smem:[#allocation15_spill]] }
 0xed7   :  { %2189 = vsyncpa [#allocation4], 1 }
 0xed8   :  { %2191 = vsyncpa [#allocation4 + $0x1], 1 }

</bundles_post_ra>
